<compile_context>
chip_gen: v7x
topology: tpu7x:2x2x1
jax: 0.10.0
libtpu: 0.0.40
codegen_flags: <defaults>
</compile_context>

<pallas_src>
import functools
import math

import jax
import jax.numpy as jnp
from jax.experimental import pallas as pl
from jax.experimental.pallas import tpu as pltpu


_LANES = 128
_MAX_TILE_ROWS = 1024   # (1024,128) f32 = 512 KiB per pipeline buffer


# ----------------------------------------------------------------------------
# Fused kernel: tiled sum((x-y)^2) accumulation + MLP penalty epilogue
# ----------------------------------------------------------------------------
def _fused_loss_kernel(x_ref, y_ref, bd1_ref, bd2_ref, w1_ref, bias1_ref,
                       w2t_ref, o_ref, *, lam, inv_n):
    step = pl.program_id(0)

    @pl.when(step == 0)
    def _init():
        o_ref[0, 0] = jnp.float32(0.0)

    # ---- data-fit partial sum on a lane-dense (tile_rows, 128) block ------
    d = x_ref[...].astype(jnp.float32) - y_ref[...].astype(jnp.float32)
    o_ref[0, 0] += jnp.sum(d * d)

    # ---- last step: periodic penalty (tiny MLP, VPU/EUP only) + finalize --
    @pl.when(step == pl.num_programs(0) - 1)
    def _epilogue():
        w1 = w1_ref[...].astype(jnp.float32)        # (D_in, H)
        bias1 = bias1_ref[...].astype(jnp.float32)  # (1, H)   sublane-broadcast
        w2t = w2t_ref[...].astype(jnp.float32)      # (1, H)   == W2^T
        d_in = w1.shape[0]

        def mlp_no_bias2(xb):                       # (NB, D_in) -> (NB, 1)
            # layer 1 as D_in broadcast FMAs (D_in tiny; unrolled at trace time).
            acc = bias1
            for j in range(d_in):
                acc = acc + xb[:, j:j + 1] * w1[j:j + 1, :]
            h = jnp.tanh(acc)                       # EUP
            # layer 2: multiply + lane reduce; bias2 cancels in the difference.
            return jnp.sum(h * w2t, axis=-1, keepdims=True)

        f1 = mlp_no_bias2(bd1_ref[...].astype(jnp.float32))
        f2 = mlp_no_bias2(bd2_ref[...].astype(jnp.float32))
        diff = f1 - f2                              # (NB, 1)
        pen = jnp.mean(diff * diff)
        o_ref[0, 0] = o_ref[0, 0] * inv_n + lam * pen


# ----------------------------------------------------------------------------
# Data-fit-only kernel (lam <= 0 path, matching the torch module's branch)
# ----------------------------------------------------------------------------
def _mse_loss_kernel(x_ref, y_ref, o_ref, *, inv_n):
    step = pl.program_id(0)

    @pl.when(step == 0)
    def _init():
        o_ref[0, 0] = jnp.float32(0.0)

    d = x_ref[...].astype(jnp.float32) - y_ref[...].astype(jnp.float32)
    o_ref[0, 0] += jnp.sum(d * d)

    @pl.when(step == pl.num_programs(0) - 1)
    def _fin():
        o_ref[0, 0] = o_ref[0, 0] * inv_n


# ----------------------------------------------------------------------------
# Wrapper
# ----------------------------------------------------------------------------
def _slab(x, tile_rows_cap=_MAX_TILE_ROWS):
    """Flatten to a lane-dense (rows, 128) slab, zero-padded so the tile divides.

    Zero padding both operands identically contributes 0 to sum((x-y)^2), so
    the final division by the TRUE element count stays exact.
    """
    flat = x.reshape(-1)
    n = flat.shape[0]
    rows = -(-n // _LANES)
    tile_rows = rows if rows <= tile_rows_cap else tile_rows_cap
    padded_rows = -(-rows // tile_rows) * tile_rows
    pad = padded_rows * _LANES - n
    if pad:
        flat = jnp.pad(flat, (0, pad))
    return flat.reshape(padded_rows, _LANES), tile_rows


def periodic_loss(inputs, targets, lam, bdry1, bdry2, params):
    """inputs/targets: NCHW; bdry1/bdry2: (NB, D_in); params: (W1, b1, W2, b2)."""
    lam = float(lam)                     # static hyperparameter (torch-style branch)
    x2d, tile_rows = _slab(inputs)
    y2d, _ = _slab(targets)
    padded_rows = x2d.shape[0]
    n_steps = padded_rows // tile_rows

    n_elems = math.prod(inputs.shape)
    inv_n = 1.0 / float(n_elems)
    itemsize = jnp.dtype(inputs.dtype).itemsize

    fit_specs = [
        pl.BlockSpec((tile_rows, _LANES), lambda i: (i, 0)),
        pl.BlockSpec((tile_rows, _LANES), lambda i: (i, 0)),
    ]
    out_spec = pl.BlockSpec((1, 1), lambda i: (0, 0),
                            memory_space=pltpu.MemorySpace.SMEM)
    compiler_params = pltpu.CompilerParams(dimension_semantics=("arbitrary",))

    if lam > 0:  # same static Python-level branch as the torch module
        w1, b1, w2, _b2 = params         # bias2 cancels in the difference
        bias1 = b1.reshape(1, -1)        # (1, H)
        w2t = w2.reshape(1, -1)          # (1, H) == W2^T (H on the lane axis)
        nb, d_in = bdry1.shape
        h = w1.shape[-1]

        cost = pl.CostEstimate(
            flops=int(3 * n_elems + 2 * nb * h * (2 * d_in + 3) + 4 * nb),
            transcendentals=int(2 * nb * h),
            bytes_accessed=int(2 * n_elems * itemsize
                               + (2 * nb * d_in + d_in * h + 2 * h) * 4 + 4),
        )

        out = pl.pallas_call(
            functools.partial(_fused_loss_kernel, lam=lam, inv_n=inv_n),
            out_shape=jax.ShapeDtypeStruct((1, 1), jnp.float32),
            grid=(n_steps,),
            in_specs=fit_specs + [
                pl.BlockSpec((nb, d_in), lambda i: (0, 0)),   # bdry1 (resident)
                pl.BlockSpec((nb, d_in), lambda i: (0, 0)),   # bdry2 (resident)
                pl.BlockSpec((d_in, h), lambda i: (0, 0)),    # W1
                pl.BlockSpec((1, h), lambda i: (0, 0)),       # b1
                pl.BlockSpec((1, h), lambda i: (0, 0)),       # W2^T
            ],
            out_specs=out_spec,
            compiler_params=compiler_params,
            cost_estimate=cost,
        )(x2d, y2d, bdry1, bdry2, w1, bias1, w2t)
        return out[0, 0]

    cost = pl.CostEstimate(
        flops=int(3 * n_elems),
        transcendentals=0,
        bytes_accessed=int(2 * n_elems * itemsize + 4),
    )
    out = pl.pallas_call(
        functools.partial(_mse_loss_kernel, inv_n=inv_n),
        out_shape=jax.ShapeDtypeStruct((1, 1), jnp.float32),
        grid=(n_steps,),
        in_specs=fit_specs,
        out_specs=out_spec,
        compiler_params=compiler_params,
        cost_estimate=cost,
    )(x2d, y2d)
    return out[0, 0]


# pure-JAX reference (keeps bias2 -> also validates the cancellation)
def periodic_loss_ref(inputs, targets, lam, bdry1, bdry2, params):
    fit = jnp.mean((inputs.astype(jnp.float32)
                    - targets.astype(jnp.float32)) ** 2)
    w1, b1, w2, b2 = params

    def mlp(x):
        return jnp.tanh(x @ w1 + b1) @ w2 + b2

    if lam > 0:
        return fit + lam * jnp.mean((mlp(bdry1) - mlp(bdry2)) ** 2)
    return fit


if __name__ == "__main__":
    key = jax.random.PRNGKey(0)
    k_in, k_tg, k_b1, k_b2, k_w1, k_w2 = jax.random.split(key, 6)

    B, C, Hs, Ws = 2, 4, 16, 16        # NCHW data-fit tensors
    NB, D_in, Hid = 16, 2, 32          # boundary points / MLP sizes
    lam = 0.5

    inputs = jax.random.normal(k_in, (B, C, Hs, Ws), dtype=jnp.float32)
    targets = jax.random.normal(k_tg, (B, C, Hs, Ws), dtype=jnp.float32)
    bdry1 = jax.random.normal(k_b1, (NB, D_in), dtype=jnp.float32)
    bdry2 = jax.random.normal(k_b2, (NB, D_in), dtype=jnp.float32)

    # deterministic MLP parameters (the `model` from loss_params)
    W1 = jax.random.normal(k_w1, (D_in, Hid), dtype=jnp.float32) * 0.1
    b1 = jnp.zeros((1, Hid), dtype=jnp.float32)
    W2 = jax.random.normal(k_w2, (Hid, 1), dtype=jnp.float32) * 0.1
    b2 = jnp.zeros((1, 1), dtype=jnp.float32)
    params = (W1, b1, W2, b2)

    # lam > 0 fused path
    loss = jax.block_until_ready(
        periodic_loss(inputs, targets, lam, bdry1, bdry2, params))
    ref = jax.block_until_ready(
        periodic_loss_ref(inputs, targets, lam, bdry1, bdry2, params))
    assert jnp.allclose(loss, ref, rtol=1e-5, atol=1e-5), (loss, ref)

    # lam <= 0 data-fit-only path
    loss0 = jax.block_until_ready(
        periodic_loss(inputs, targets, 0.0, bdry1, bdry2, params))
    ref0 = jax.block_until_ready(
        periodic_loss_ref(inputs, targets, 0.0, bdry1, bdry2, params))
    assert jnp.allclose(loss0, ref0, rtol=1e-5, atol=1e-5), (loss0, ref0)

    print("KERNEL_OK")
</pallas_src>

<mosaic_0001>
module attributes {stable_mosaic.version = 11 : i64} {
  func.func @_fused_loss_kernel(%arg0: i32, %arg1: memref<16x128xf32, #tpu.memory_space<vmem>>, %arg2: memref<16x128xf32, #tpu.memory_space<vmem>>, %arg3: memref<16x2xf32, #tpu.memory_space<vmem>>, %arg4: memref<16x2xf32, #tpu.memory_space<vmem>>, %arg5: memref<2x32xf32, #tpu.memory_space<vmem>>, %arg6: memref<1x32xf32, #tpu.memory_space<vmem>>, %arg7: memref<1x32xf32, #tpu.memory_space<vmem>>, %arg8: memref<1x1xf32, #tpu.memory_space<smem>>) attributes {dimension_semantics = [#tpu.dimension_semantics<arbitrary>], iteration_bounds = array<i64: 1>, scalar_prefetch = 0 : i64, scratch_operands = 0 : i64, tpu.core_type = #tpu.core_type<tc>, window_params = [{transform_indices = @transform_0, window_bounds = array<i64: 16, 128>}, {transform_indices = @transform_1, window_bounds = array<i64: 16, 128>}, {pipeline_mode = #tpu.pipeline_mode<synchronous>, transform_indices = @transform_2, window_bounds = array<i64: 16, 2>}, {pipeline_mode = #tpu.pipeline_mode<synchronous>, transform_indices = @transform_3, window_bounds = array<i64: 16, 2>}, {pipeline_mode = #tpu.pipeline_mode<synchronous>, transform_indices = @transform_4, window_bounds = array<i64: 2, 32>}, {pipeline_mode = #tpu.pipeline_mode<synchronous>, transform_indices = @transform_5, window_bounds = array<i64: 1, 32>}, {pipeline_mode = #tpu.pipeline_mode<synchronous>, transform_indices = @transform_6, window_bounds = array<i64: 1, 32>}, {transform_indices = @transform_7, window_bounds = array<i64: 1, 1>}]} {
    %c0_i32 = arith.constant 0 : i32
    %0 = arith.cmpi eq, %arg0, %c0_i32 : i32
    %1 = arith.extui %0 : i1 to i32
    %c0_i32_0 = arith.constant 0 : i32
    %2 = arith.cmpi ne, %1, %c0_i32_0 : i32
    scf.if %2 {
      %cst_10 = arith.constant 0.000000e+00 : f32
      %c0_11 = arith.constant 0 : index
      %c0_12 = arith.constant 0 : index
      %17 = memref.load %arg8[%c0_11, %c0_12] : memref<1x1xf32, #tpu.memory_space<smem>>
      memref.store %cst_10, %arg8[%c0_11, %c0_12] : memref<1x1xf32, #tpu.memory_space<smem>>
    } else {
    }
    %c0 = arith.constant 0 : index
    %c0_1 = arith.constant 0 : index
    %3 = vector.load %arg1[%c0, %c0_1] : memref<16x128xf32, #tpu.memory_space<vmem>>, vector<16x128xf32>
    %c0_2 = arith.constant 0 : index
    %c0_3 = arith.constant 0 : index
    %4 = vector.load %arg2[%c0_2, %c0_3] : memref<16x128xf32, #tpu.memory_space<vmem>>, vector<16x128xf32>
    %5 = arith.subf %3, %4 : vector<16x128xf32>
    %c0_4 = arith.constant 0 : index
    %c0_5 = arith.constant 0 : index
    %6 = memref.load %arg8[%c0_4, %c0_5] : memref<1x1xf32, #tpu.memory_space<smem>>
    %7 = arith.mulf %5, %5 : vector<16x128xf32>
    %8 = vector.shape_cast %7 : vector<16x128xf32> to vector<1x16x128xf32>
    %cst = arith.constant dense<0.000000e+00> : vector<1xf32>
    %9 = vector.multi_reduction <add>, %8, %cst [1, 2] : vector<1x16x128xf32> to vector<1xf32>
    %10 = vector.shape_cast %9 : vector<1xf32> to vector<1x1x1xf32>
    %11 = vector.extract %10[0, 0, 0] : f32 from vector<1x1x1xf32>
    %12 = arith.addf %6, %11 : f32
    %c0_6 = arith.constant 0 : index
    %c0_7 = arith.constant 0 : index
    %13 = memref.load %arg8[%c0_6, %c0_7] : memref<1x1xf32, #tpu.memory_space<smem>>
    memref.store %12, %arg8[%c0_6, %c0_7] : memref<1x1xf32, #tpu.memory_space<smem>>
    %c0_i32_8 = arith.constant 0 : i32
    %14 = arith.cmpi eq, %arg0, %c0_i32_8 : i32
    %15 = arith.extui %14 : i1 to i32
    %c0_i32_9 = arith.constant 0 : i32
    %16 = arith.cmpi ne, %15, %c0_i32_9 : i32
    scf.if %16 {
      %c0_10 = arith.constant 0 : index
      %c0_11 = arith.constant 0 : index
      %17 = vector.load %arg5[%c0_10, %c0_11] : memref<2x32xf32, #tpu.memory_space<vmem>>, vector<2x32xf32>
      %c0_12 = arith.constant 0 : index
      %c0_13 = arith.constant 0 : index
      %18 = vector.load %arg6[%c0_12, %c0_13] : memref<1x32xf32, #tpu.memory_space<vmem>>, vector<1x32xf32>
      %c0_14 = arith.constant 0 : index
      %c0_15 = arith.constant 0 : index
      %19 = vector.load %arg7[%c0_14, %c0_15] : memref<1x32xf32, #tpu.memory_space<vmem>>, vector<1x32xf32>
      %c0_16 = arith.constant 0 : index
      %c0_17 = arith.constant 0 : index
      %20 = vector.load %arg3[%c0_16, %c0_17] : memref<16x2xf32, #tpu.memory_space<vmem>>, vector<16x2xf32>
      %21 = vector.extract_strided_slice %20 {offsets = [0, 0], sizes = [16, 1], strides = [1, 1]} : vector<16x2xf32> to vector<16x1xf32>
      %22 = vector.extract_strided_slice %17 {offsets = [0, 0], sizes = [1, 32], strides = [1, 1]} : vector<2x32xf32> to vector<1x32xf32>
      %23 = vector.broadcast %21 : vector<16x1xf32> to vector<16x32xf32>
      %24 = vector.broadcast %22 : vector<1x32xf32> to vector<16x32xf32>
      %25 = arith.mulf %23, %24 : vector<16x32xf32>
      %26 = vector.broadcast %18 : vector<1x32xf32> to vector<16x32xf32>
      %27 = arith.addf %26, %25 : vector<16x32xf32>
      %28 = vector.extract_strided_slice %20 {offsets = [0, 1], sizes = [16, 1], strides = [1, 1]} : vector<16x2xf32> to vector<16x1xf32>
      %29 = vector.extract_strided_slice %17 {offsets = [1, 0], sizes = [1, 32], strides = [1, 1]} : vector<2x32xf32> to vector<1x32xf32>
      %30 = vector.broadcast %28 : vector<16x1xf32> to vector<16x32xf32>
      %31 = vector.broadcast %29 : vector<1x32xf32> to vector<16x32xf32>
      %32 = arith.mulf %30, %31 : vector<16x32xf32>
      %33 = arith.addf %27, %32 : vector<16x32xf32>
      %34 = math.tanh %33 : vector<16x32xf32>
      %35 = vector.broadcast %19 : vector<1x32xf32> to vector<16x32xf32>
      %36 = arith.mulf %34, %35 : vector<16x32xf32>
      %cst_18 = arith.constant dense<0.000000e+00> : vector<16xf32>
      %37 = vector.multi_reduction <add>, %36, %cst_18 [1] : vector<16x32xf32> to vector<16xf32>
      %38 = vector.shape_cast %37 : vector<16xf32> to vector<16x1xf32>
      %c0_19 = arith.constant 0 : index
      %c0_20 = arith.constant 0 : index
      %39 = vector.load %arg4[%c0_19, %c0_20] : memref<16x2xf32, #tpu.memory_space<vmem>>, vector<16x2xf32>
      %40 = vector.extract_strided_slice %39 {offsets = [0, 0], sizes = [16, 1], strides = [1, 1]} : vector<16x2xf32> to vector<16x1xf32>
      %41 = vector.extract_strided_slice %17 {offsets = [0, 0], sizes = [1, 32], strides = [1, 1]} : vector<2x32xf32> to vector<1x32xf32>
      %42 = vector.broadcast %40 : vector<16x1xf32> to vector<16x32xf32>
      %43 = vector.broadcast %41 : vector<1x32xf32> to vector<16x32xf32>
      %44 = arith.mulf %42, %43 : vector<16x32xf32>
      %45 = vector.broadcast %18 : vector<1x32xf32> to vector<16x32xf32>
      %46 = arith.addf %45, %44 : vector<16x32xf32>
      %47 = vector.extract_strided_slice %39 {offsets = [0, 1], sizes = [16, 1], strides = [1, 1]} : vector<16x2xf32> to vector<16x1xf32>
      %48 = vector.extract_strided_slice %17 {offsets = [1, 0], sizes = [1, 32], strides = [1, 1]} : vector<2x32xf32> to vector<1x32xf32>
      %49 = vector.broadcast %47 : vector<16x1xf32> to vector<16x32xf32>
      %50 = vector.broadcast %48 : vector<1x32xf32> to vector<16x32xf32>
      %51 = arith.mulf %49, %50 : vector<16x32xf32>
      %52 = arith.addf %46, %51 : vector<16x32xf32>
      %53 = math.tanh %52 : vector<16x32xf32>
      %54 = vector.broadcast %19 : vector<1x32xf32> to vector<16x32xf32>
      %55 = arith.mulf %53, %54 : vector<16x32xf32>
      %cst_21 = arith.constant dense<0.000000e+00> : vector<16xf32>
      %56 = vector.multi_reduction <add>, %55, %cst_21 [1] : vector<16x32xf32> to vector<16xf32>
      %57 = vector.shape_cast %56 : vector<16xf32> to vector<16x1xf32>
      %58 = arith.subf %38, %57 : vector<16x1xf32>
      %59 = arith.mulf %58, %58 : vector<16x1xf32>
      %60 = vector.shape_cast %59 : vector<16x1xf32> to vector<1x16x1xf32>
      %cst_22 = arith.constant dense<0.000000e+00> : vector<1xf32>
      %61 = vector.multi_reduction <add>, %60, %cst_22 [1, 2] : vector<1x16x1xf32> to vector<1xf32>
      %62 = vector.shape_cast %61 : vector<1xf32> to vector<1x1x1xf32>
      %63 = vector.extract %62[0, 0, 0] : f32 from vector<1x1x1xf32>
      %cst_23 = arith.constant 1.600000e+01 : f32
      %64 = arith.divf %63, %cst_23 : f32
      %c0_24 = arith.constant 0 : index
      %c0_25 = arith.constant 0 : index
      %65 = memref.load %arg8[%c0_24, %c0_25] : memref<1x1xf32, #tpu.memory_space<smem>>
      %cst_26 = arith.constant 4.8828125E-4 : f32
      %66 = arith.mulf %65, %cst_26 : f32
      %cst_27 = arith.constant 5.000000e-01 : f32
      %67 = arith.mulf %cst_27, %64 : f32
      %68 = arith.addf %66, %67 : f32
      %c0_28 = arith.constant 0 : index
      %c0_29 = arith.constant 0 : index
      %69 = memref.load %arg8[%c0_28, %c0_29] : memref<1x1xf32, #tpu.memory_space<smem>>
      memref.store %68, %arg8[%c0_28, %c0_29] : memref<1x1xf32, #tpu.memory_space<smem>>
    } else {
    }
    return
  }
  func.func @transform_0(%arg0: i32) -> (i32, i32) {
    %c0_i32 = arith.constant 0 : i32
    %c0_i32_0 = arith.constant 0 : i32
    return %arg0, %c0_i32 : i32, i32
  }
  func.func @transform_1(%arg0: i32) -> (i32, i32) {
    %c0_i32 = arith.constant 0 : i32
    %c0_i32_0 = arith.constant 0 : i32
    return %arg0, %c0_i32 : i32, i32
  }
  func.func @transform_2(%arg0: i32) -> (i32, i32) {
    %c0_i32 = arith.constant 0 : i32
    %c0_i32_0 = arith.constant 0 : i32
    %c0_i32_1 = arith.constant 0 : i32
    return %c0_i32, %c0_i32_0 : i32, i32
  }
  func.func @transform_3(%arg0: i32) -> (i32, i32) {
    %c0_i32 = arith.constant 0 : i32
    %c0_i32_0 = arith.constant 0 : i32
    %c0_i32_1 = arith.constant 0 : i32
    return %c0_i32, %c0_i32_0 : i32, i32
  }
  func.func @transform_4(%arg0: i32) -> (i32, i32) {
    %c0_i32 = arith.constant 0 : i32
    %c0_i32_0 = arith.constant 0 : i32
    %c0_i32_1 = arith.constant 0 : i32
    return %c0_i32, %c0_i32_0 : i32, i32
  }
  func.func @transform_5(%arg0: i32) -> (i32, i32) {
    %c0_i32 = arith.constant 0 : i32
    %c0_i32_0 = arith.constant 0 : i32
    %c0_i32_1 = arith.constant 0 : i32
    return %c0_i32, %c0_i32_0 : i32, i32
  }
  func.func @transform_6(%arg0: i32) -> (i32, i32) {
    %c0_i32 = arith.constant 0 : i32
    %c0_i32_0 = arith.constant 0 : i32
    %c0_i32_1 = arith.constant 0 : i32
    return %c0_i32, %c0_i32_0 : i32, i32
  }
  func.func @transform_7(%arg0: i32) -> (i32, i32) {
    %c0_i32 = arith.constant 0 : i32
    %c0_i32_0 = arith.constant 0 : i32
    %c0_i32_1 = arith.constant 0 : i32
    return %c0_i32, %c0_i32_0 : i32, i32
  }
}

</mosaic_0001>

<bundles_post_ra>
// kernel: tpu_custom_call.1
= control target key start
LH: loop header
LB: loop body
LE: loop exit
PB: predicated region body
PF: predicated region fallthrough
CT: control target
= control target key end

     0   :  { %v230_v2 = vmov 0   ;;  %s322_s0 = inlined_call_operand.vmem [shape: f32[16,128], index: 0, kind: input, shape index: {}]   ;;  %s323_s1 = inlined_call_operand.vmem [shape: f32[16,128], index: 1, kind: input, shape index: {}]   ;;  %s324_s2 = inlined_call_operand.vmem [shape: f32[16,2], index: 2, kind: input, shape index: {}]   ;;  %s325_s3 = inlined_call_operand.vmem [shape: f32[16,2], index: 3, kind: input, shape index: {}]   ;;  %s326_s4 = inlined_call_operand.vmem [shape: f32[2,32], index: 4, kind: input, shape index: {}]   ;;  %s327_s5 = inlined_call_operand.vmem [shape: f32[1,32], index: 5, kind: input, shape index: {}]   ;;  %s328_s6 = inlined_call_operand.vmem [shape: f32[1,32], index: 6, kind: input, shape index: {}]   ;;  %s329_s7 = inlined_call_operand.hbm [shape: f32[1,1], index: 7, kind: output, shape index: {}]  }
   0x1   :  { %v120_v0 = vld [vmem:[%s325_s3] sm:$0xff]  ;;  %207 = vset.pattern.permute.xlu1 %v230_v2  ;;  %206 = vset.pattern.permute.xlu0 %v230_v2 }
   0x2   :  { %v61_v1 = vld [vmem:[%s324_s2] sm:$0xff]  ;;  %124 = vperm.xlu1 %207, %v120_v0  }
   0x3   :  { %65 = vperm.xlu0 %206, %v61_v1  }
   0x4   :  { %12 = vsyncpa [#allocation3], 0  ;;  %v121_v3 = vld [vmem:[%s325_s3 + $0x8] sm:$0xff]  ;;  %v231_v5 = vmov 1   ;;  %v73_v6 = vlaneseq  ;;  %v58_v9 = vld [vmem:[%s326_s4] sm:$0x3] }
   0x5   :  { %v62_v4 = vld [vmem:[%s324_s2 + $0x8] sm:$0xff]  ;;  %v196_v17 = vld [vmem:[%s327_s5] ss:$0 sm:$0xff]  ;;  %vm113_vm0 = vcmask 261120   ;;  %vm162_vm1 = vcmask 7168   ;;  %s218_s24 = scalar_lea.hbm %s329_s7, 16 }
   0x6   :  { %129 = vperm.xlu1 %207, %v121_v3   ;;  %v74_v7 = vshrl.u32 %v73_v6, 7  ;;  %v33_v38 = vld [vmem:[%s322_s0] sm:$0xff]  ;;  %v34_v39 = vld [vmem:[%s322_s0 + $0x8] sm:$0xff]  ;;  %p219_p0 = scmp.ne.s32.totalorder %s329_s7, %s218_s24  ;;  %p222_p1 = scmp.lt.u32.totalorder %s218_s24, %s329_s7 }
   0x7   :  { %70 = vperm.xlu0 %206, %v62_v4   ;;  %v35_v40 = vld [vmem:[%s323_s1] sm:$0xff]  ;;  %v36_v41 = vld [vmem:[%s323_s1 + $0x8] sm:$0xff] }
   0x8   :  { %v75_v8 = vsub.s32 0, %v74_v7  ;;  %v97_v13 = vsub.s32 1, %v74_v7  ;;  %v197_v42 = vld [vmem:[%s328_s6] ss:$0 sm:$0xff]  ;;  %v37_v44 = vsub.f32 %v33_v38, %v35_v40  ;;  %v38_v45 = vsub.f32 %v34_v39, %v36_v41  ;;  %p224_p2 = pnand %p222_p1, %p219_p0 }
   0xa   :  { %209 = vset.pattern.permute.xlu1 %v231_v5  ;;  %v76_v12 = vrot.slane %v58_v9, %v75_v8  ;;  %v98_v19 = vrot.slane %v58_v9, %v97_v13  ;;  %v40_v52 = vmul.f32 %v37_v44, %v37_v44  ;;  %v41_v53 = vmul.f32 %v38_v45, %v38_v45 }
   0xb   :  { %208 = vset.pattern.permute.xlu0 %v231_v5  ;;  %92 = vperm.xlu1 %209, %v62_v4  }
   0xc   :  { %88 = vperm.xlu0 %208, %v61_v1   ;;  %v42_v59 = vadd.f32 %v41_v53, %v40_v52 }
   0xf   :  { %137 = vperm.xlu1 %209, %v120_v0  }
  0x10   :  { %141 = vperm.xlu0 %208, %v121_v3  }
  0x81   :  { %v125_v10 = vpop.permute.xlu1 %124 }
  0x82   :  { %v66_v11 = vpop.permute.xlu0 %65  ;;  %v132_v20 = vmul.f32 %v125_v10, %v76_v12 }
  0x83   :  { %v77_v16 = vmul.f32 %v76_v12, %v66_v11 }
  0x84   :  { %v134_v30 = vadd.f32 %v196_v17, %v132_v20 }
  0x85   :  { %v130_v14 = vpop.permute.xlu1 %129  ;;  %v85_v21 = vadd.f32 %v196_v17, %v77_v16 }
  0x86   :  { %v71_v15 = vpop.permute.xlu0 %70  ;;  %v133_v24 = vmul.f32 %v130_v14, %v76_v12 }
  0x87   :  { %v78_v18 = vmul.f32 %v76_v12, %v71_v15 }
  0x88   :  { %v135_v33 = vadd.f32 %v196_v17, %v133_v24 }
  0x89   :  { %v86_v25 = vadd.f32 %v196_v17, %v78_v18 }
  0x8a   :  { %v93_v22 = vpop.permute.xlu1 %92 }
  0x8b   :  { %v89_v23 = vpop.permute.xlu0 %88  ;;  %v100_v26 = vmul.f32 %v98_v19, %v93_v22 }
  0x8c   :  { %v99_v27 = vmul.f32 %v98_v19, %v89_v23 }
  0x8d   :  { %v102_v28 = vadd.f32 %v100_v26, %v86_v25 }
  0x8e   :  { %v101_v29 = vadd.f32 %v99_v27, %v85_v21  ;;  %v138_v31 = vpop.permute.xlu1 %137 }
  0x8f   :  { %v142_v32 = vpop.permute.xlu0 %141  ;;  %210 = vtanh.f32 %v102_v28  ;;  %v144_v34 = vmul.f32 %v138_v31, %v98_v19 }
  0x90   :  { %v145_v35 = vmul.f32 %v142_v32, %v98_v19  ;;  %212 = vtanh.f32 %v101_v29 }
  0x91   :  { %v146_v36 = vadd.f32 %v144_v34, %v134_v30 }
  0x92   :  { %v147_v37 = vadd.f32 %v145_v35, %v135_v33 }
  0x93   :  { %214 = vtanh.f32 %v146_v36 }
  0x94   :  { %216 = vtanh.f32 %v147_v37 }
  0x99   :  { %v211_v43 = vpop.eup %210 }
  0x9a   :  { %v213_v46 = vpop.eup %212  ;;  %v112_v47 = vmul.f32 %v211_v43, %v197_v42 }
  0x9b   :  { %v111_v48 = vmul.f32 %v213_v46, %v197_v42 }
  0x9c   :  { %v117_v49 = vsel %vm113_vm0, %v112_v47, 0.0 }
  0x9d   :  { %v215_v50 = vpop.eup %214  ;;  %118 = vadd.xlane.f32.xlu0 %v117_v49  ;;  %v114_v51 = vsel %vm113_vm0, %v111_v48, 0.0 }
  0x9e   :  { %v217_v54 = vpop.eup %216  ;;  %115 = vadd.xlane.f32.xlu1 %v114_v51  ;;  %v150_v55 = vmul.f32 %v215_v50, %v197_v42 }
  0x9f   :  { %v151_v56 = vmul.f32 %v217_v54, %v197_v42 }
  0xa0   :  { %v152_v57 = vsel %vm113_vm0, %v150_v55, 0.0 }
  0xa1   :  { %153 = vadd.xlane.f32.xlu0 %v152_v57  ;;  %v155_v58 = vsel %vm113_vm0, %v151_v56, 0.0 }
  0xa2   :  { %156 = vadd.xlane.f32.xlu1 %v155_v58 }
  0xa5   :  { %43 = vadd.xlane.f32.xlu0 %v42_v59 }
 0x12a   :  { %v119_v60 = vpop.xlane.xlu0 %118 }
 0x12b   :  { %v116_v61 = vpop.xlane.xlu1 %115 }
 0x12e   :  { %v154_v62 = vpop.xlane.xlu0 %153 }
 0x12f   :  { %v158_v63 = vsub.f32 %v116_v61, %v154_v62  ;;  %v157_v0 = vpop.xlane.xlu1 %156 }
 0x130   :  { %v159_v1 = vsub.f32 %v119_v60, %v157_v0 }
 0x131   :  { %v160_v2 = vmul.f32 %v158_v63, %v158_v63 }
 0x132   :  { %v161_v3 = vmul.f32 %v159_v1, %v159_v1  ;;  %v44_v7 = vpop.xlane.xlu0 %43 }
 0x133   :  { %v163_v4 = vsel %vm162_vm1, %v160_v2, 0.0  ;;  %v45_v8 = vrot.slane %v44_v7, 4 }
 0x134   :  { %v164_v5 = vsel %vm162_vm1, %v161_v3, 0.0 }
 0x135   :  { %v165_v6 = vadd.f32 %v164_v5, %v163_v4  ;;  %v46_v9 = vadd.f32 %v45_v8, %v44_v7 }
 0x137   :  { %166 = vadd.xlane.f32.xlu1 %v165_v6  ;;  %v47_v10 = vrot.slane %v46_v9, 2 }
 0x139   :  { %v48_v11 = vadd.f32 %v47_v10, %v46_v9 }
 0x13b   :  { %v49_v12 = vrot.slane %v48_v11, 1 }
 0x13d   :  { %v50_v13 = vadd.f32 %v49_v12, %v48_v11 }
 0x13f   :  { %198 = vpush %v50_v13 }
 0x170   :  { %s199_s0 = spop %198 }
 0x171   :  { %s179_s19 = smul.f32 0.00048828125, %s199_s0 }
 0x1c4   :  { %v167_v14 = vpop.xlane.xlu1 %166 }
 0x1c5   :  { %v168_v15 = vrot.slane %v167_v14, 4 }
 0x1c7   :  { %v169_v16 = vadd.f32 %v168_v15, %v167_v14 }
 0x1c9   :  { %v170_v17 = vrot.slane %v169_v16, 2 }
 0x1cb   :  { %v171_v18 = vadd.f32 %v170_v17, %v169_v16 }
 0x1cd   :  { %v172_v19 = vrot.slane %v171_v18, 1 }
 0x1cf   :  { %v173_v20 = vadd.f32 %v172_v19, %v171_v18 }
 0x1d1   :  { %200 = vpush %v173_v20 }
 0x202   :  { %s201_s1 = spop %200 }
 0x203   :  { %s177_s6 = smul.f32 0.0625, %s201_s1 }
 0x205   :  { %s180_s20 = smul.f32 0.5, %s177_s6 }
 0x207   :  { %s181_s21 = sadd.f32 %s180_s20, %s179_s19 }
 0x209   :  { %182 = sst [smem:[#allocation2]] %s181_s21 }
 0x20a   :  { %227 = shalt.err (!%p224_p2)
}
 0x20b   :  { %s232_s29 = smov [#allocation2]  }
 0x20c   :  { %190 = dma.smem_to_hbm %s232_s29, 16, %s329_s7, [#allocation3]  }
 0x20d   :  { %228 = dma.done.wait [#allocation3], 16  }
 0x20e   :  { %229 = vsyncadd [#allocation3], 4294967280 }
 0x20f   :  { %194 = sfence }
 0x210   :  { %195 = vsyncpa [#allocation3], 1 }

</bundles_post_ra>
